<compile_context>
chip_gen: v5e
topology: v5e:2x2
jax: 0.10.0
libtpu: 0.0.40
codegen_flags: <defaults>
</compile_context>

<pallas_src>
import functools
import math

import jax
import jax.numpy as jnp
from jax.experimental import pallas as pl
from jax.experimental.pallas import tpu as pltpu


def dice_outcome_kernel(
    nhidden, input_size, n_clusters,
    # batch-tiled input slab: [x | demov]
    xin_ref,
    # grid-constant weights/biases (VMEM-resident across grid steps)
    w_enc_ref, b_enc_ref,            # autoencoder encoder (stand-in)
    w_dc_ref, b_dc_ref,              # fused [w_dec | w_cls], [b_dec | b_cls]
    w_out_ref, b_out_ref,            # linear_decoder_output
    w_rc_row_ref, w_rv_row_ref, b_reg_ref,   # fused (mask-folded) regression heads
    # batch-tiled fused output slab: [encoded | decoded | cno | outcome]
    out_ref,
):
    f32 = jnp.float32
    xin = xin_ref[...]
    x = xin[:, :input_size]
    demov = xin[:, input_size:]

    # --- autoencoder (stand-in MLP), encoder half ---
    encoded = jnp.tanh(
        jnp.dot(x, w_enc_ref[...], preferred_element_type=f32) + b_enc_ref[...])

    # --- fused: autoencoder decoder-hidden + linear_classifier_c off `encoded` ---
    dc = jnp.dot(encoded, w_dc_ref[...], preferred_element_type=f32) + b_dc_ref[...]
    decoded_h = jnp.tanh(dc[:, :nhidden])
    cno = dc[:, nhidden:]

    # --- linear_decoder_output: nhidden -> input_size ---
    decoded = (jnp.dot(decoded_h, w_out_ref[...], preferred_element_type=f32)
               + b_out_ref[...])

    # --- Softmax(dim=1) over clusters (exact divide; off the bottleneck path) ---
    m = jnp.max(cno, axis=-1, keepdims=True)
    e = jnp.exp(cno - m)
    output_c = e / jnp.sum(e, axis=-1, keepdims=True)

    # --- regression heads on the VPU (N=1, K<=6: skip the MXU).
    #     masked_fill is folded into w_rc_row (zeros at masked clusters). ---
    from_c = jnp.sum(output_c * w_rc_row_ref[...], axis=-1, keepdims=True)
    from_v = jnp.sum(demov * w_rv_row_ref[...], axis=-1, keepdims=True)
    outcome = jax.nn.sigmoid(from_c + from_v + b_reg_ref[...])

    # --- single fused output slab: one writeback DMA stream per tile ---
    o0 = nhidden
    o1 = o0 + input_size
    o2 = o1 + n_clusters
    out_ref[:, :o0] = encoded
    out_ref[:, o0:o1] = decoded
    out_ref[:, o1:o2] = cno
    out_ref[:, o2:] = outcome


def dice_outcome_forward(x, demov, mask, params, *, tile_b=None):
    """Runs the 'outcome_logistic_regression' branch as one batch-tiled Pallas call.

    Returns (encoded_x, decoded_x, output_c_no_activate, output_outcome)."""
    B, input_size = x.shape
    n_demov = demov.shape[1]
    nhidden = params["w_enc"].shape[1]
    n_clusters = params["w_cls"].shape[1]
    total_out = nhidden + input_size + n_clusters + 1

    # --- one-time wrapper-side weight fusion ---
    w_dc = jnp.concatenate([params["w_dec"], params["w_cls"]], axis=1)   # (nh, nh+nc)
    b_dc = jnp.concatenate([params["b_dec"], params["b_cls"]], axis=1)   # (1, nh+nc)
    if mask is None:
        keep = jnp.ones((1, n_clusters), jnp.float32)
    else:
        keep = jnp.where(mask.astype(jnp.float32).reshape(1, n_clusters) > 0.5,
                         0.0, 1.0)
    w_rc_row = params["w_rc"].T * keep                                   # (1, nc), masked
    w_rv_row = params["w_rv"].T                                          # (1, n_demov)
    b_reg = params["b_rc"] + params["b_rv"]                              # (1, 1)

    # --- single batch-tiled input stream: [x | demov] ---
    xin = jnp.concatenate([x, demov], axis=1)                            # (B, in+nd)

    # --- batch tiling: big tiles to amortize per-step overhead (cap 1024 rows),
    #     sublane-aligned, and keep >= 2 grid steps when the batch allows so the
    #     "parallel" axis can shard across v7x's two TensorCores. ---
    if tile_b is None:
        b8 = max(8, pl.cdiv(B, 8) * 8)
        if b8 <= 16:
            tile_b = b8
        else:
            tile_b = min(1024, pl.cdiv(pl.cdiv(b8, 2), 8) * 8)
    b_pad = pl.cdiv(B, tile_b) * tile_b
    if b_pad != B:
        xin = jnp.pad(xin, ((0, b_pad - B), (0, 0)))
    grid = (b_pad // tile_b,)

    def batch_spec(feat):
        return pl.BlockSpec((tile_b, feat), lambda i: (i, 0))

    def const_spec(shape):
        return pl.BlockSpec(shape, lambda i, _n=len(shape): (0,) * _n)

    ins = (
        xin,
        params["w_enc"], params["b_enc"],
        w_dc, b_dc,
        params["w_out"], params["b_out"],
        w_rc_row, w_rv_row, b_reg,
    )
    in_specs = [batch_spec(input_size + n_demov)] + [
        const_spec(a.shape) for a in ins[1:]
    ]
    out_shape = jax.ShapeDtypeStruct((b_pad, total_out), jnp.float32)
    out_specs = batch_spec(total_out)

    # Advisory cost estimate so XLA schedules this custom call sensibly.
    flops = 2 * b_pad * (input_size * nhidden
                         + nhidden * (nhidden + n_clusters)
                         + nhidden * input_size
                         + n_clusters + n_demov)
    transcendentals = b_pad * (2 * nhidden + n_clusters + 1)
    bytes_accessed = 4 * (sum(a.size for a in ins) + b_pad * total_out)

    slab = pl.pallas_call(
        functools.partial(dice_outcome_kernel, nhidden, input_size, n_clusters),
        grid=grid,
        in_specs=in_specs,
        out_specs=out_specs,
        out_shape=out_shape,
        compiler_params=pltpu.CompilerParams(
            dimension_semantics=("parallel",),
            vmem_limit_bytes=32 * 1024 * 1024,
        ),
        cost_estimate=pl.CostEstimate(
            flops=flops,
            transcendentals=transcendentals,
            bytes_accessed=bytes_accessed,
        ),
    )(*ins)

    o0 = nhidden
    o1 = o0 + input_size
    o2 = o1 + n_clusters
    enc = slab[:B, :o0]
    dec = slab[:B, o0:o1]
    cno = slab[:B, o1:o2]
    out = slab[:B, o2:]
    return enc, dec, cno, out


def make_params(key, input_size, nhidden, n_clusters, n_dummy_demov_fea):
    """Deterministic init mirroring model_2.init_weights (uniform(-0.1, 0.1), bias=0).
    Weights stored pre-transposed as (in, out)."""
    ks = jax.random.split(key, 6)
    u = lambda k, shape: jax.random.uniform(k, shape, jnp.float32, -0.1, 0.1)
    return {
        # stand-in autoencoder
        "w_enc": u(ks[0], (input_size, nhidden)), "b_enc": jnp.zeros((1, nhidden), jnp.float32),
        "w_dec": u(ks[1], (nhidden, nhidden)),    "b_dec": jnp.zeros((1, nhidden), jnp.float32),
        # linear_decoder_output
        "w_out": u(ks[2], (nhidden, input_size)), "b_out": jnp.zeros((1, input_size), jnp.float32),
        # linear_classifier_c
        "w_cls": u(ks[3], (nhidden, n_clusters)), "b_cls": jnp.zeros((1, n_clusters), jnp.float32),
        # linear_regression_c
        "w_rc": u(ks[4], (n_clusters, 1)),        "b_rc": jnp.zeros((1, 1), jnp.float32),
        # linear_regression_demov
        "w_rv": u(ks[5], (n_dummy_demov_fea, 1)), "b_rv": jnp.zeros((1, 1), jnp.float32),
    }


def _reference(x, demov, mask, p):
    enc = jnp.tanh(x @ p["w_enc"] + p["b_enc"])
    dec_h = jnp.tanh(enc @ p["w_dec"] + p["b_dec"])
    dec = dec_h @ p["w_out"] + p["b_out"]
    cno = enc @ p["w_cls"] + p["b_cls"]
    c = jax.nn.softmax(cno, axis=1)
    c = jnp.where(mask > 0.5, 0.0, c)
    out = jax.nn.sigmoid(c @ p["w_rc"] + p["b_rc"] + demov @ p["w_rv"] + p["b_rv"])
    return enc, dec, cno, out


if __name__ == "__main__":
    B = 24
    input_size = 32
    nhidden = 32
    n_clusters = 4
    n_dummy_demov_fea = 6

    key = jax.random.PRNGKey(0)
    kx, kd, kp = jax.random.split(key, 3)
    x = jax.random.normal(kx, (B, input_size), jnp.float32)
    demov = jax.random.normal(kd, (B, n_dummy_demov_fea), jnp.float32)
    # mask one cluster (cluster index 1), broadcast over batch
    mask = jnp.zeros((1, n_clusters), jnp.float32).at[0, 1].set(1.0)

    params = make_params(kp, input_size, nhidden, n_clusters, n_dummy_demov_fea)
    r_enc, r_dec, r_cno, r_out = _reference(x, demov, mask, params)

    # 1) auto tile selection (>= 2 grid steps: exercises padding + multi-step grid)
    enc, dec, cno, outcome = jax.block_until_ready(
        dice_outcome_forward(x, demov, mask, params))
    assert jnp.allclose(enc, r_enc, rtol=1e-4, atol=1e-5)
    assert jnp.allclose(dec, r_dec, rtol=1e-4, atol=1e-5)
    assert jnp.allclose(cno, r_cno, rtol=1e-4, atol=1e-5)
    assert jnp.allclose(outcome, r_out, rtol=1e-4, atol=1e-5)

    # 2) explicit small tile (3-step grid path)
    enc, dec, cno, outcome = jax.block_until_ready(
        dice_outcome_forward(x, demov, mask, params, tile_b=8))
    assert jnp.allclose(enc, r_enc, rtol=1e-4, atol=1e-5)
    assert jnp.allclose(dec, r_dec, rtol=1e-4, atol=1e-5)
    assert jnp.allclose(cno, r_cno, rtol=1e-4, atol=1e-5)
    assert jnp.allclose(outcome, r_out, rtol=1e-4, atol=1e-5)

    print("KERNEL_OK")
</pallas_src>

<mosaic_0001>
module attributes {stable_mosaic.version = 11 : i64} {
  func.func @dice_outcome_kernel(%arg0: i32, %arg1: memref<16x38xf32, #tpu.memory_space<vmem>>, %arg2: memref<32x32xf32, #tpu.memory_space<vmem>>, %arg3: memref<1x32xf32, #tpu.memory_space<vmem>>, %arg4: memref<32x36xf32, #tpu.memory_space<vmem>>, %arg5: memref<1x36xf32, #tpu.memory_space<vmem>>, %arg6: memref<32x32xf32, #tpu.memory_space<vmem>>, %arg7: memref<1x32xf32, #tpu.memory_space<vmem>>, %arg8: memref<1x4xf32, #tpu.memory_space<vmem>>, %arg9: memref<1x6xf32, #tpu.memory_space<vmem>>, %arg10: memref<1x1xf32, #tpu.memory_space<vmem>>, %arg11: memref<16x69xf32, #tpu.memory_space<vmem>>) attributes {dimension_semantics = [#tpu.dimension_semantics<parallel>], iteration_bounds = array<i64: 2>, scalar_prefetch = 0 : i64, scratch_operands = 0 : i64, tpu.core_type = #tpu.core_type<tc>, window_params = [{transform_indices = @transform_0, window_bounds = array<i64: 16, 38>}, {pipeline_mode = #tpu.pipeline_mode<synchronous>, transform_indices = @transform_1, window_bounds = array<i64: 32, 32>}, {pipeline_mode = #tpu.pipeline_mode<synchronous>, transform_indices = @transform_2, window_bounds = array<i64: 1, 32>}, {pipeline_mode = #tpu.pipeline_mode<synchronous>, transform_indices = @transform_3, window_bounds = array<i64: 32, 36>}, {pipeline_mode = #tpu.pipeline_mode<synchronous>, transform_indices = @transform_4, window_bounds = array<i64: 1, 36>}, {pipeline_mode = #tpu.pipeline_mode<synchronous>, transform_indices = @transform_5, window_bounds = array<i64: 32, 32>}, {pipeline_mode = #tpu.pipeline_mode<synchronous>, transform_indices = @transform_6, window_bounds = array<i64: 1, 32>}, {pipeline_mode = #tpu.pipeline_mode<synchronous>, transform_indices = @transform_7, window_bounds = array<i64: 1, 4>}, {pipeline_mode = #tpu.pipeline_mode<synchronous>, transform_indices = @transform_8, window_bounds = array<i64: 1, 6>}, {pipeline_mode = #tpu.pipeline_mode<synchronous>, transform_indices = @transform_9, window_bounds = array<i64: 1, 1>}, {transform_indices = @transform_10, window_bounds = array<i64: 16, 69>}]} {
    %c0 = arith.constant 0 : index
    %c0_0 = arith.constant 0 : index
    %0 = vector.load %arg1[%c0, %c0_0] : memref<16x38xf32, #tpu.memory_space<vmem>>, vector<16x38xf32>
    %1 = vector.extract_strided_slice %0 {offsets = [0, 0], sizes = [16, 32], strides = [1, 1]} : vector<16x38xf32> to vector<16x32xf32>
    %2 = vector.extract_strided_slice %0 {offsets = [0, 32], sizes = [16, 6], strides = [1, 1]} : vector<16x38xf32> to vector<16x6xf32>
    %c0_1 = arith.constant 0 : index
    %c0_2 = arith.constant 0 : index
    %3 = vector.load %arg2[%c0_1, %c0_2] : memref<32x32xf32, #tpu.memory_space<vmem>>, vector<32x32xf32>
    %cst = arith.constant dense<0.000000e+00> : vector<16x32xf32>
    %4 = tpu.matmul %1, %3, %cst {dimension_numbers = #tpu.dot_dimension_numbers<[1], [0], [0], [1], [0, 0, 1, 1], [], []>} : vector<16x32xf32>, vector<32x32xf32>, vector<16x32xf32> -> vector<16x32xf32>
    %c0_3 = arith.constant 0 : index
    %c0_4 = arith.constant 0 : index
    %5 = vector.load %arg3[%c0_3, %c0_4] : memref<1x32xf32, #tpu.memory_space<vmem>>, vector<1x32xf32>
    %6 = vector.broadcast %5 : vector<1x32xf32> to vector<16x32xf32>
    %7 = arith.addf %4, %6 : vector<16x32xf32>
    %8 = math.tanh %7 : vector<16x32xf32>
    %c0_5 = arith.constant 0 : index
    %c0_6 = arith.constant 0 : index
    %9 = vector.load %arg4[%c0_5, %c0_6] : memref<32x36xf32, #tpu.memory_space<vmem>>, vector<32x36xf32>
    %cst_7 = arith.constant dense<0.000000e+00> : vector<16x36xf32>
    %10 = tpu.matmul %8, %9, %cst_7 {dimension_numbers = #tpu.dot_dimension_numbers<[1], [0], [0], [1], [0, 0, 1, 1], [], []>} : vector<16x32xf32>, vector<32x36xf32>, vector<16x36xf32> -> vector<16x36xf32>
    %c0_8 = arith.constant 0 : index
    %c0_9 = arith.constant 0 : index
    %11 = vector.load %arg5[%c0_8, %c0_9] : memref<1x36xf32, #tpu.memory_space<vmem>>, vector<1x36xf32>
    %12 = vector.broadcast %11 : vector<1x36xf32> to vector<16x36xf32>
    %13 = arith.addf %10, %12 : vector<16x36xf32>
    %14 = vector.extract_strided_slice %13 {offsets = [0, 0], sizes = [16, 32], strides = [1, 1]} : vector<16x36xf32> to vector<16x32xf32>
    %15 = math.tanh %14 : vector<16x32xf32>
    %16 = vector.extract_strided_slice %13 {offsets = [0, 32], sizes = [16, 4], strides = [1, 1]} : vector<16x36xf32> to vector<16x4xf32>
    %c0_10 = arith.constant 0 : index
    %c0_11 = arith.constant 0 : index
    %17 = vector.load %arg6[%c0_10, %c0_11] : memref<32x32xf32, #tpu.memory_space<vmem>>, vector<32x32xf32>
    %cst_12 = arith.constant dense<0.000000e+00> : vector<16x32xf32>
    %18 = tpu.matmul %15, %17, %cst_12 {dimension_numbers = #tpu.dot_dimension_numbers<[1], [0], [0], [1], [0, 0, 1, 1], [], []>} : vector<16x32xf32>, vector<32x32xf32>, vector<16x32xf32> -> vector<16x32xf32>
    %c0_13 = arith.constant 0 : index
    %c0_14 = arith.constant 0 : index
    %19 = vector.load %arg7[%c0_13, %c0_14] : memref<1x32xf32, #tpu.memory_space<vmem>>, vector<1x32xf32>
    %20 = vector.broadcast %19 : vector<1x32xf32> to vector<16x32xf32>
    %21 = arith.addf %18, %20 : vector<16x32xf32>
    %cst_15 = arith.constant dense<0xFF800000> : vector<16xf32>
    %22 = vector.multi_reduction <maximumf>, %16, %cst_15 [1] : vector<16x4xf32> to vector<16xf32>
    %23 = vector.shape_cast %22 : vector<16xf32> to vector<16x1xf32>
    %24 = vector.broadcast %23 : vector<16x1xf32> to vector<16x4xf32>
    %25 = arith.subf %16, %24 : vector<16x4xf32>
    %26 = math.exp %25 : vector<16x4xf32>
    %cst_16 = arith.constant dense<0.000000e+00> : vector<16xf32>
    %27 = vector.multi_reduction <add>, %26, %cst_16 [1] : vector<16x4xf32> to vector<16xf32>
    %28 = vector.shape_cast %27 : vector<16xf32> to vector<16x1xf32>
    %29 = vector.broadcast %28 : vector<16x1xf32> to vector<16x4xf32>
    %30 = arith.divf %26, %29 : vector<16x4xf32>
    %c0_17 = arith.constant 0 : index
    %c0_18 = arith.constant 0 : index
    %31 = vector.load %arg8[%c0_17, %c0_18] : memref<1x4xf32, #tpu.memory_space<vmem>>, vector<1x4xf32>
    %32 = vector.broadcast %31 : vector<1x4xf32> to vector<16x4xf32>
    %33 = arith.mulf %30, %32 : vector<16x4xf32>
    %cst_19 = arith.constant dense<0.000000e+00> : vector<16xf32>
    %34 = vector.multi_reduction <add>, %33, %cst_19 [1] : vector<16x4xf32> to vector<16xf32>
    %35 = vector.shape_cast %34 : vector<16xf32> to vector<16x1xf32>
    %c0_20 = arith.constant 0 : index
    %c0_21 = arith.constant 0 : index
    %36 = vector.load %arg9[%c0_20, %c0_21] : memref<1x6xf32, #tpu.memory_space<vmem>>, vector<1x6xf32>
    %37 = vector.broadcast %36 : vector<1x6xf32> to vector<16x6xf32>
    %38 = arith.mulf %2, %37 : vector<16x6xf32>
    %cst_22 = arith.constant dense<0.000000e+00> : vector<16xf32>
    %39 = vector.multi_reduction <add>, %38, %cst_22 [1] : vector<16x6xf32> to vector<16xf32>
    %40 = vector.shape_cast %39 : vector<16xf32> to vector<16x1xf32>
    %41 = arith.addf %35, %40 : vector<16x1xf32>
    %c0_23 = arith.constant 0 : index
    %c0_24 = arith.constant 0 : index
    %42 = vector.load %arg10[%c0_23, %c0_24] : memref<1x1xf32, #tpu.memory_space<vmem>>, vector<1x1xf32>
    %43 = vector.broadcast %42 : vector<1x1xf32> to vector<16x1xf32>
    %44 = arith.addf %41, %43 : vector<16x1xf32>
    %45 = arith.negf %44 : vector<16x1xf32>
    %46 = math.exp %45 : vector<16x1xf32>
    %cst_25 = arith.constant 1.000000e+00 : f32
    %47 = vector.broadcast %cst_25 : f32 to vector<16x1xf32>
    %48 = arith.addf %47, %46 : vector<16x1xf32>
    %49 = arith.divf %47, %48 : vector<16x1xf32>
    %c0_26 = arith.constant 0 : index
    %c0_27 = arith.constant 0 : index
    %50 = vector.load %arg11[%c0_26, %c0_27] : memref<16x69xf32, #tpu.memory_space<vmem>>, vector<16x32xf32>
    tpu.vector_store %arg11[%c0_26, %c0_27], %8 {strides = array<i32>} : memref<16x69xf32, #tpu.memory_space<vmem>>, vector<16x32xf32>,
    %c0_28 = arith.constant 0 : index
    %c32 = arith.constant 32 : index
    %51 = vector.load %arg11[%c0_28, %c32] : memref<16x69xf32, #tpu.memory_space<vmem>>, vector<16x32xf32>
    tpu.vector_store %arg11[%c0_28, %c32], %21 {strides = array<i32>} : memref<16x69xf32, #tpu.memory_space<vmem>>, vector<16x32xf32>,
    %c0_29 = arith.constant 0 : index
    %c64 = arith.constant 64 : index
    %52 = vector.load %arg11[%c0_29, %c64] : memref<16x69xf32, #tpu.memory_space<vmem>>, vector<16x4xf32>
    tpu.vector_store %arg11[%c0_29, %c64], %16 {strides = array<i32>} : memref<16x69xf32, #tpu.memory_space<vmem>>, vector<16x4xf32>,
    %c0_30 = arith.constant 0 : index
    %c68 = arith.constant 68 : index
    %53 = vector.load %arg11[%c0_30, %c68] : memref<16x69xf32, #tpu.memory_space<vmem>>, vector<16x1xf32>
    tpu.vector_store %arg11[%c0_30, %c68], %49 {strides = array<i32>} : memref<16x69xf32, #tpu.memory_space<vmem>>, vector<16x1xf32>,
    return
  }
  func.func @transform_0(%arg0: i32) -> (i32, i32) {
    %c0_i32 = arith.constant 0 : i32
    %c0_i32_0 = arith.constant 0 : i32
    return %arg0, %c0_i32 : i32, i32
  }
  func.func @transform_1(%arg0: i32) -> (i32, i32) {
    %c0_i32 = arith.constant 0 : i32
    %c0_i32_0 = arith.constant 0 : i32
    %c0_i32_1 = arith.constant 0 : i32
    return %c0_i32, %c0_i32_0 : i32, i32
  }
  func.func @transform_2(%arg0: i32) -> (i32, i32) {
    %c0_i32 = arith.constant 0 : i32
    %c0_i32_0 = arith.constant 0 : i32
    %c0_i32_1 = arith.constant 0 : i32
    return %c0_i32, %c0_i32_0 : i32, i32
  }
  func.func @transform_3(%arg0: i32) -> (i32, i32) {
    %c0_i32 = arith.constant 0 : i32
    %c0_i32_0 = arith.constant 0 : i32
    %c0_i32_1 = arith.constant 0 : i32
    return %c0_i32, %c0_i32_0 : i32, i32
  }
  func.func @transform_4(%arg0: i32) -> (i32, i32) {
    %c0_i32 = arith.constant 0 : i32
    %c0_i32_0 = arith.constant 0 : i32
    %c0_i32_1 = arith.constant 0 : i32
    return %c0_i32, %c0_i32_0 : i32, i32
  }
  func.func @transform_5(%arg0: i32) -> (i32, i32) {
    %c0_i32 = arith.constant 0 : i32
    %c0_i32_0 = arith.constant 0 : i32
    %c0_i32_1 = arith.constant 0 : i32
    return %c0_i32, %c0_i32_0 : i32, i32
  }
  func.func @transform_6(%arg0: i32) -> (i32, i32) {
    %c0_i32 = arith.constant 0 : i32
    %c0_i32_0 = arith.constant 0 : i32
    %c0_i32_1 = arith.constant 0 : i32
    return %c0_i32, %c0_i32_0 : i32, i32
  }
  func.func @transform_7(%arg0: i32) -> (i32, i32) {
    %c0_i32 = arith.constant 0 : i32
    %c0_i32_0 = arith.constant 0 : i32
    %c0_i32_1 = arith.constant 0 : i32
    return %c0_i32, %c0_i32_0 : i32, i32
  }
  func.func @transform_8(%arg0: i32) -> (i32, i32) {
    %c0_i32 = arith.constant 0 : i32
    %c0_i32_0 = arith.constant 0 : i32
    %c0_i32_1 = arith.constant 0 : i32
    return %c0_i32, %c0_i32_0 : i32, i32
  }
  func.func @transform_9(%arg0: i32) -> (i32, i32) {
    %c0_i32 = arith.constant 0 : i32
    %c0_i32_0 = arith.constant 0 : i32
    %c0_i32_1 = arith.constant 0 : i32
    return %c0_i32, %c0_i32_0 : i32, i32
  }
  func.func @transform_10(%arg0: i32) -> (i32, i32) {
    %c0_i32 = arith.constant 0 : i32
    %c0_i32_0 = arith.constant 0 : i32
    return %arg0, %c0_i32 : i32, i32
  }
}

</mosaic_0001>

<bundles_post_ra>
// kernel: tpu_custom_call.1
= control target key start
LH: loop header
LB: loop body
LE: loop exit
PB: predicated region body
PF: predicated region fallthrough
CT: control target
= control target key end

     0   :  { %s1514_s0 = inlined_call_operand.hbm [shape: f32[32,38], index: 0, kind: input, shape index: {}]   ;;  %s1515_s1 = inlined_call_operand.hbm [shape: f32[32,32], index: 1, kind: input, shape index: {}]   ;;  %s1516_s2 = inlined_call_operand.vmem [shape: f32[1,32], index: 2, kind: input, shape index: {}]   ;;  %s1517_s3 = inlined_call_operand.hbm [shape: f32[32,36], index: 3, kind: input, shape index: {}]   ;;  %s1518_s4 = inlined_call_operand.vmem [shape: f32[1,36], index: 4, kind: input, shape index: {}]   ;;  %s1519_s5 = inlined_call_operand.hbm [shape: f32[32,32], index: 5, kind: input, shape index: {}]   ;;  %s1520_s6 = inlined_call_operand.vmem [shape: f32[1,32], index: 6, kind: input, shape index: {}]   ;;  %s1521_s7 = inlined_call_operand.vmem [shape: f32[1,4], index: 7, kind: input, shape index: {}]   ;;  %s1522_s8 = inlined_call_operand.vmem [shape: f32[1,6], index: 8, kind: input, shape index: {}]   ;;  %s1523_s9 = inlined_call_operand.<no memory space> [shape: f32[1,1], index: 9, kind: input, shape index: {}]   ;;  %s1524_s10 = inlined_call_operand.hbm [shape: f32[32,69], index: 10, kind: output, shape index: {}]  }
   0x1   :  { %1527 = sst [smem:[#allocation16_spill]] %s1515_s1  ;;  %v15_v0 = vstv %s1523_s9 }
   0x2   :  { %1528 = sst [smem:[#allocation17_spill]] %s1517_s3  ;;  %16 = vst [vmem:[#allocation2] sm:$0x1] %v15_v0 }
   0x3   :  { %1529 = sst [smem:[#allocation18_spill]] %s1519_s5 }
   0x4   :  { %17 = vsyncpa [#allocation4], 0 }
   0x5   :  { %19 = vsyncpa [#allocation4 + $0x1], 0 }
   0x6   :  { %20 = vsyncpa [#allocation7], 0 }
   0x7   :  { %21 = vsyncpa [#allocation10], 0 }
   0x8   :  { %22 = vsyncpa [#allocation5], 0 }
   0x9   :  { %24 = vsyncpa [#allocation5 + $0x1], 0  ;;  %s1266_s15 = smov 0   ;;  %s1268_s16 = smov 0  }
   0xa   :  { %s1270_s17 = smov 0   ;;  %s1272_s18 = smov 0  }
   0xb LB: > { %s1287_s9 = sadd.s32 4294967295, %s1196_s18   ;;  %s854_s19 = sadd.s32 4294967294, %s1196_s18   ;;  %s1196_s18 = sphi %s1272_s18, %s1545_s18   ;;  %s1192_s17 = sphi %s1270_s17, %s1544_s17   ;;  %s1188_s16 = sphi %s1268_s16, %s1543_s16   ;;  %s1184_s15 = sphi %s1266_s15, %s1542_s15  }
   0xc   : > { %p50_p0 = scmp.ne.s32.totalorder %s1188_s16, %s1184_s15  ;;  %p51_p1 = scmp.eq.s32.totalorder %s1287_s9, 0 }
   0xd   : > { %p263_p2 = scmp.eq.s32.totalorder %s1287_s9, 1  ;;  %p269_p3 = scmp.eq.s32.totalorder %s854_s19, 1 }
   0xe   : > { %p1296_p4 = por %p51_p1, %p50_p0  ;;  %p855_p5 = scmp.ge.s32.totalorder %s1196_s18, 1 }
   0xf   : > { %p1301_p6 = por %p269_p3, %p50_p0  ;;  %p276_p7 = scmp.lt.s32.totalorder %s1196_s18, 3 }
  0x10   : > { %s1532_s1 = sld [smem:[#allocation16_spill]]  ;;  %s1198_s26 = smov [#allocation6]  }
  0x11   : > { %p1309_p8 = pnand %p855_p5, %p276_p7  ;;  %s289_s27 = sshll.u32 %s1198_s26, 4  ;;  %s290_s27 = int_to_ptr.vmem [resolvable:$true] %s289_s27 }
  0x12   : > { %s1535_s3 = sld [smem:[#allocation17_spill]]  ;;  %s1525_s12 = smov 128  }
  0x13   : > { %p904_p9 = pneg %p1309_p8  ;;  %s1526_s13 = smov 8  }
  0x14   : > { %s1201_s14 = smov [#allocation8]   ;;  %s1536_s5 = sld [smem:[#allocation18_spill]] }
  0x15   : > { %p1317_p10 = pnand %p904_p9, %p51_p1  ;;  %s306_s19 = sshll.u32 %s1201_s14, 4  ;;  %s307_s19 = int_to_ptr.vmem [resolvable:$true] %s306_s19 }
  0x16   : > { %s287_s24 = sshll.u32 %s1532_s1, 4  ;;  %s1339_s29 = sadd.s32 1, %s1196_s18   ;;  %s288_s24 = int_to_ptr.hbm [resolvable:$true] %s287_s24 }
  0x17   : > { %907 = dma.hbm_to_vmem [thread:$0]  (!%p1317_p10), %s288_s24, 512, %s290_s27, [#allocation7], %s1525_s12, %s1525_s12, %s1526_s13  }
  0x18   : > { %s304_s11 = sshll.u32 %s1535_s3, 4  ;;  %s1202_s24 = smov [#allocation9]   ;;  %s305_s11 = int_to_ptr.hbm [resolvable:$true] %s304_s11 }
  0x19   : > { %910 = dma.hbm_to_vmem [thread:$0]  (!%p1317_p10), %s305_s11, 512, %s307_s19, [#allocation7], %s1525_s12, %s1525_s12, %s1526_s13  }
  0x1a   : > { %s321_s26 = sshll.u32 %s1536_s5, 4  ;;  %s323_s27 = sshll.u32 %s1202_s24, 4  ;;  %s322_s26 = int_to_ptr.hbm [resolvable:$true] %s321_s26  ;;  %s324_s27 = int_to_ptr.vmem [resolvable:$true] %s323_s27 }
  0x1b   : > { %913 = dma.hbm_to_vmem [thread:$0]  (!%p1317_p10), %s322_s26, 512, %s324_s27, [#allocation10], %s1525_s12, %s1525_s12, %s1526_s13  }
  0x1c   : > { %s34_s30 = ssub.s32 %s1196_s18, %s1339_s29  ;;  %s37_s14 = sadd.s32 1, %s1192_s17 }
  0x1d   : > { %p35_p12 = scmp.eq.s32.totalorder %s34_s30, 0  ;;  %p44_p13 = scmp.ne.s32.totalorder %s1192_s17, %s1188_s16 }
  0x1e   : > { %p45_p0 = scmp.eq.s32.totalorder %s1196_s18, 0  ;;  %p925_p5 = scmp.lt.s32.totalorder %s1196_s18, 2 }
  0x1f   : > { %s1353_s22 = scalar_select %p35_p12, %s1192_s17, %s37_s14  }
  0x20   : > { %p1357_p3 = por %p263_p2, %p44_p13  ;;  %s349_s19 = sand.u32 1, %s1192_s17  }
  0x21   : > { %s882_s28 = sshll.u32 %s1196_s18, 4  ;;  %p46_p7 = por %p45_p0, %p44_p13 }
  0x22   : > { %s860_s23 = sshll.u32 %s349_s19, 4  ;;  %s358_s26 = scalar_lea.hbm %s1514_s0, %s882_s28 }
  0x23   : > { %s359_s27 = sshll.u32 %s358_s26, 4  ;;  %s353_s30 = scalar_lea.vmem [#allocation3], %s860_s23  ;;  %s360_s27 = int_to_ptr.hbm [resolvable:$true] %s359_s27 }
  0x24   : > { %s361_s12 = sshll.u32 %s353_s30, 4  ;;  %p1367_p9 = pnand %p925_p5, %p46_p7  ;;  %s362_s12 = int_to_ptr.vmem [resolvable:$true] %s361_s12 }
  0x25   : > { %s350_s13 = scalar_lea.sflag [#allocation4], %s349_s19  ;;  %s1092_s3 = sshra.s32 %s360_s27, 4  ;;  %s1093_s3 = int_to_ptr.hbm [resolvable:$true] %s1092_s3 }
  0x26   : > { %s1094_s5 = scalar_lea.hbm %s1093_s3, 16  ;;  %p1096_p10 = pneg %p1367_p9 }
  0x27   : > { %p1095_p2 = scmp.ne.s32.totalorder %s1093_s3, %s1094_s5  ;;  %s1099_s23 = scalar_lea.hbm %s1514_s0, 32 }
  0x28   : > { %p1100_p0 = scmp.lt.s32.totalorder %s1093_s3, %s1514_s0  ;;  %p1101_p5 = scmp.lt.s32.totalorder %s1099_s23, %s1094_s5 }
  0x29   : > { %p1097_p12 = pnand %p1096_p10, %p1095_p2 }
  0x2a   : > { %p1102_p7 = por %p1101_p5, %p1100_p0 }
  0x2b   : > { %p1098_p13 = pneg %p1097_p12 }
  0x2d   : > { %p1103_p11 = pnand %p1102_p7, %p1098_p13 }
  0x2f   : > { %1106 = shalt.err (!%p1103_p11)
}
  0x30   : > { %s1539_s19 = smov 8   ;;  %s1540_s30 = smov 128  }
  0x31   : > { %917 = dma.hbm_to_vmem [thread:$0]  (!%p1367_p9), %s360_s27, 256, %s362_s12, %s350_s13, %s1540_s30, %s1540_s30, %s1539_s19  }
  0x32   : > { %373 = sbr.rel (%p1309_p8) target bundleno = 1112 (0x458), region = 60  ;;  %s1387_s1 = sand.u32 (!%p1309_p8), 1, %s1188_s16  }
  0x33   : > { %s864_s3 = sshll.u32 (!%p1309_p8), %s1387_s1, 4  ;;  %s376_s5 = scalar_lea.sflag (!%p1309_p8), [#allocation4], %s1387_s1 }
  0x34   : > { %s379_s28 = scalar_lea.vmem (!%p1309_p8), [#allocation3], %s864_s3 }
  0x37   : > { %1167 = dma.done.wait (%p1296_p4), %s376_s5, 256  }
  0x38   : > { %1169 = vsyncadd (%p1296_p4), %s376_s5, 4294967040 }
  0x39   : > { %1171 = dma.done.wait (%p51_p1), [#allocation7], 1024  }
  0x3a   : > { %1173 = vsyncadd (%p51_p1), [#allocation7], 4294966272 }
  0x3b   : > { %1175 = dma.done.wait (%p51_p1), [#allocation10], 512  }
  0x3c   : > { %1177 = vsyncadd (%p51_p1), [#allocation10], 4294966784  ;;  %v439_v1 = vld [vmem:[#allocation6 + $0x18] sm:$0xff]  ;;  %v438_v2 = vld [vmem:[#allocation6 + $0x10] sm:$0xff]  ;;  %vm444_vm0 = vcmask 261120   ;;  %s1419_s12 = scalar_lea.vmem [#allocation11], %s864_s3 }
  0x3d   : > { %463 = vmatpush.msra.mxu0 %v439_v1  ;;  %884 = vmatpush.msra.mxu3 %v439_v1  ;;  %v437_v3 = vld [vmem:[#allocation6 + $0x8] sm:$0xff]  ;;  %v436_v4 = vld [vmem:[#allocation6] sm:$0xff]  ;;  %v479_v7 = vld [vmem:[#allocation8 + $0x18] sm:$0xff]  ;;  %vm552_vm1 = vcmask 294144   ;;  %s1203_s14 = smov 96   ;;  %s1204_s30 = smov 32  }
  0x3e   : > { %v1405_v5 = vld [vmem:[%s379_s28] sm:$0xff]  ;;  %v1407_v6 = vld [vmem:[%s379_s28 + $0x8] sm:$0xff]  ;;  %502 = vmatpush.msra.mxu1 %v479_v7  ;;  %vm573_vm2 = vcmask 31744   ;;  %vm648_vm11 = vcmask 48128   ;;  %vm711_vm12 = vcmask 523520   ;;  %vm722_vm13 = vcmask 556544  }
  0x3f   : > { %464 = vmatpush.msra.mxu0 %v438_v2  ;;  %885 = vmatpush.msra.mxu3 %v438_v2  ;;  %v478_v8 = vld [vmem:[#allocation8 + $0x10] sm:$0xff]  ;;  %v477_v9 = vld [vmem:[#allocation8 + $0x8] sm:$0xff]  ;;  %v476_v10 = vld [vmem:[#allocation8] sm:$0xff]  ;;  %s1205_s28 = smov 68   ;;  %s883_s20 = sshll.u32 %s1287_s9, 4 }
  0x40   : > { %503 = vmatpush.msra.mxu1 %v478_v8  ;;  %v972_v11 = vld [vmem:[%s1516_s2] ss:$0 sm:$0xff]  ;;  %v517_v19 = vld [vmem:[#allocation9 + $0x10] sm:$0xff]  ;;  %v516_v20 = vld [vmem:[#allocation9 + $0x8] sm:$0xff]  ;;  %s748_s27 = scalar_lea.hbm %s1524_s10, %s883_s20  ;;  %s737_s24 = scalar_lea.sflag [#allocation5], %s1387_s1 }
  0x41   : > { %465 = vmatpush.msra.mxu0 %v437_v3  ;;  %886 = vmatpush.msra.mxu3 %v437_v3  ;;  %v518_v18 = vld [vmem:[#allocation9 + $0x18] sm:$0xff]  ;;  %v515_v21 = vld [vmem:[#allocation9] sm:$0xff]  ;;  %s751_s23 = sshll.u32 %s748_s27, 4  ;;  %s1142_s3 = scalar_lea.hbm %s1524_s10, 32  ;;  %s752_s23 = int_to_ptr.hbm [resolvable:$true] %s751_s23 }
  0x42   : > { %504 = vmatpush.msra.mxu1 %v477_v9  ;;  %541 = vmatpush.msra.mxu2 %v518_v18  ;;  %v973_v22 = vld [vmem:[%s1518_s4] ss:$0 sm:$0xff]  ;;  %s1136_s26 = sshra.s32 %s752_s23, 4  ;;  %s1137_s26 = int_to_ptr.hbm [resolvable:$true] %s1136_s26 }
  0x43   : > { %466 = vmatpush.msra.mxu0 %v436_v4  ;;  %887 = vmatpush.msra.mxu3 %v436_v4  ;;  %v975_v39 = vld [vmem:[%s1521_s7] ss:$0 sm:$0xff]  ;;  %s1138_s19 = scalar_lea.hbm %s1137_s26, 16  ;;  %p1143_p11 = scmp.lt.s32.totalorder %s1137_s26, %s1524_s10 }
  0x44   : > { %869 = vmatmul.msk.f32.vlgmr.msra.gmra.mxu0 %vm444_vm0, %v1405_v5  ;;  %870 = vmatmul.msk.f32.vlgmr.msra.gmra.mxu3 %vm444_vm0, %v1407_v6  ;;  %v976_v40 = vld [vmem:[%s1522_s8] ss:$0 sm:$0xff]  ;;  %p1139_p1 = scmp.ne.s32.totalorder %s1137_s26, %s1138_s19  ;;  %p1144_p9 = scmp.lt.s32.totalorder %s1142_s3, %s1138_s19 }
  0x45   : > { %505 = vmatpush.msra.mxu1 %v476_v10  ;;  %542 = vmatpush.msra.mxu2 %v517_v19 }
  0x46   : > { %p1140_p4 = pnand %p1139_p1, %p1357_p3  ;;  %p1145_p2 = por %p1144_p9, %p1143_p11 }
  0x47   : > { %543 = vmatpush.msra.mxu2 %v516_v20 }
  0x48   : > { %p1141_p8 = pneg %p1140_p4 }
  0x49   : > { %544 = vmatpush.msra.mxu2 %v515_v21 }
  0x4a   : > { %p1146_p10 = pnand %p1145_p2, %p1141_p8 }
  0xc1   : > { %v468_v12 = vpop.f32.mrf.mxu0 }
  0xc2   : > { %v469_v13 = vadd.f32 %v972_v11, %v468_v12 }
  0xc4   : > { %978 = vtanh.f32 %v469_v13 }
  0xc7   : > { %v471_v14 = vpop.f32.mrf.mxu3 }
  0xc8   : > { %v472_v15 = vadd.f32 %v972_v11, %v471_v14  ;;  %v974_v14 = vld [vmem:[%s1520_s6] ss:$0 sm:$0xff] }
  0xca   : > { %v979_v16 = vpop.eup %978  ;;  %980 = vtanh.f32 %v472_v15 }
  0xcb   : > { %871 = vmatmul.msk.f32.vlgmr.msra.gmra.mxu1 %vm444_vm0, %v979_v16  ;;  %701 = vst.msk [vmem:[%s1419_s12] sm:$0xff] %vm444_vm0, %v979_v16 }
  0xd0   : > { %v981_v17 = vpop.eup %980 }
  0xd1   : > { %702 = vst.msk [vmem:[%s1419_s12 + $0x8] sm:$0xff] %vm444_vm0, %v981_v17 }
  0xd3   : > { %872 = vmatmul.msk.f32.gmra.mxu1 %vm444_vm0, %v981_v17 }
 0x148   : > { %v507_v23 = vpop.f32.mrf.mxu1 }
 0x149   : > { %v1429_v24 = vadd.f32 %v973_v22, %v507_v23 }
 0x14b   : > { %982 = vtanh.f32 %v1429_v24  ;;  %v553_v25 = vsel %vm552_vm1, %v1429_v24, -inf }
 0x14c   : > { %554 = vmax.xlane.f32.xlu0 %v553_v25 }
 0x150   : > { %v510_v26 = vpop.f32.mrf.mxu1 }
 0x151   : > { %v983_v27 = vpop.eup %982  ;;  %v1433_v28 = vadd.f32 %v973_v22, %v510_v26 }
 0x152   : > { %873 = vmatmul.msk.f32.vlgmr.msra.gmra.mxu2 %vm444_vm0, %v983_v27 }
 0x153   : > { %984 = vtanh.f32 %v1433_v28  ;;  %v556_v29 = vsel %vm552_vm1, %v1433_v28, -inf }
 0x154   : > { %557 = vmax.xlane.f32.xlu0 %v556_v29  ;;  %v977_v29 = vld [vmem:[#allocation2] ss:$0 sm:$0xff] }
 0x159   : > { %v985_v30 = vpop.eup %984 }
 0x15a   : > { %874 = vmatmul.msk.f32.gmra.mxu2 %vm444_vm0, %v985_v30 }
 0x168   : > { %613 = vrot.lane.b32.xlu0 %v975_v39, %s1204_s30 }
 0x1bf   : > { %v555_v31 = vpop.xlane.xlu0 %554 }
 0x1c0   : > { %v559_v32 = vsub.f32 %v1429_v24, %v555_v31 }
 0x1c2   : > { %v561_v33 = vmul.f32 1.442695, %v559_v32 }
 0x1c4   : > { %986 = vpow2.f32 %v561_v33 }
 0x1c7   : > { %v558_v34 = vpop.xlane.xlu0 %557 }
 0x1c8   : > { %v560_v35 = vsub.f32 %v1433_v28, %v558_v34 }
 0x1ca   : > { %v987_v36 = vpop.eup %986  ;;  %v563_v37 = vmul.f32 1.442695, %v560_v35 }
 0x1cb   : > { %567 = vrot.lane.b32.xlu1 %v987_v36, %s1203_s14 }
 0x1cc   : > { %988 = vpow2.f32 %v563_v37 }
 0x1d2   : > { %v989_v38 = vpop.eup %988 }
 0x1d3   : > { %569 = vrot.lane.b32.xlu1 %v989_v38, %s1203_s14 }
 0x1d5   : > { %v546_v15 = vpop.f32.mrf.mxu2 }
 0x1d6   : > { %v547_v16 = vadd.f32 %v974_v14, %v546_v15 }
 0x1da   : > { %v614_v61 = vpop.permute.xlu0 %613 }
 0x1db   : > { %635 = vrot.lane.b32.xlu1 %v976_v40, %s1204_s30 }
 0x1dd   : > { %v549_v22 = vpop.f32.mrf.mxu2 }
 0x1de   : > { %v550_v23 = vadd.f32 %v974_v14, %v549_v22 }
 0x23d   : > { %v568_v41 = vpop.permute.xlu1 %567 }
 0x23e   : > { %v574_v42 = vsel %vm573_vm2, %v568_v41, 0.0 }
 0x23f   : > { %575 = vadd.xlane.f32.xlu2 %v574_v42 }
 0x245   : > { %v570_v43 = vpop.permute.xlu1 %569 }
 0x246   : > { %v577_v44 = vsel %vm573_vm2, %v570_v43, 0.0 }
 0x247   : > { %578 = vadd.xlane.f32.xlu2 %v577_v44 }
 0x24d   : > { %v636_v45 = vpop.permute.xlu1 %635 }
 0x24e   : > { %v639_v46 = vmul.f32 %v636_v45, %v1407_v6  ;;  %v638_v11 = vmul.f32 %v636_v45, %v1405_v5 }
 0x250   : > { %644 = vrot.lane.b32.xlu0 %v639_v46, %s1203_s14 }
 0x2b2   : > { %v576_v47 = vpop.xlane.xlu2 %575 }
 0x2b3   : > { %990 = vrcp.f32 %v576_v47  ;;  %v591_v52 = vand.u32 2147483648, %v576_v47  ;;  %v589_v54 = vand.u32 2147483647, %v576_v47  ;;  %vm585_vm4 = vweird.f32 %v576_v47 }
 0x2b5   : > { %v592_v57 = vor.u32 1.1754944e-38, %v591_v52  ;;  %vm590_vm6 = vcmp.eq.f32.partialorder %v589_v54, 8.507059e+37 }
 0x2b9   : > { %v991_v48 = vpop.eup %990 }
 0x2ba   : > { %v581_v49 = vmul.f32 %v991_v48, %v576_v47  ;;  %v579_v50 = vpop.xlane.xlu2 %578  ;;  %vm586_vm3 = vweird.f32 %v991_v48 }
 0x2bb   : > { %992 = vrcp.f32 %v579_v50  ;;  %vm587_vm5 = vmor %vm585_vm4, %vm586_vm3  ;;  %v606_v0 = vand.u32 2147483648, %v579_v50  ;;  %v604_v2 = vand.u32 2147483647, %v579_v50  ;;  %vm600_vm8 = vweird.f32 %v579_v50 }
 0x2bc   : > { %v582_v51 = vsub.f32 1.0, %v581_v49 }
 0x2bd   : > { %v607_v6 = vor.u32 1.1754944e-38, %v606_v0  ;;  %vm605_vm10 = vcmp.eq.f32.partialorder %v604_v2, 8.507059e+37 }
 0x2be   : > { %v583_v53 = vmul.f32 %v991_v48, %v582_v51 }
 0x2c0   : > { %v584_v55 = vadd.f32 %v991_v48, %v583_v53 }
 0x2c1   : > { %v993_v56 = vpop.eup %992 }
 0x2c2   : > { %v596_v58 = vmul.f32 %v993_v56, %v579_v50  ;;  %v588_v59 = vsel %vm587_vm5, %v991_v48, %v584_v55  ;;  %vm601_vm7 = vweird.f32 %v993_v56  ;;  %v645_v5 = vpop.permute.xlu0 %644 }
 0x2c3   : > { %v593_v60 = vsel %vm590_vm6, %v592_v57, %v588_v59  ;;  %vm602_vm9 = vmor %vm600_vm8, %vm601_vm7  ;;  %v652_v19 = vsel %vm648_vm11, %v645_v5, 0.0  ;;  %vm733_vm6 = vcmask 564768  }
 0x2c4   : > { %v597_v62 = vsub.f32 1.0, %v596_v58  ;;  %v594_v63 = vmul.f32 %v987_v36, %v593_v60 }
 0x2c6   : > { %v598_v1 = vmul.f32 %v993_v56, %v597_v62  ;;  %v616_v3 = vmul.f32 %v614_v61, %v594_v63 }
 0x2c8   : > { %v599_v4 = vadd.f32 %v993_v56, %v598_v1  ;;  %620 = vrot.lane.b32.xlu2 %v616_v3, %s1203_s14 }
 0x2ca   : > { %v603_v7 = vsel %vm602_vm9, %v993_v56, %v599_v4 }
 0x2cb   : > { %v608_v8 = vsel %vm605_vm10, %v607_v6, %v603_v7 }
 0x2cc   : > { %v609_v9 = vmul.f32 %v989_v38, %v608_v8 }
 0x2ce   : > { %v617_v10 = vmul.f32 %v614_v61, %v609_v9 }
 0x2d0   : > { %622 = vrot.lane.b32.xlu1 %v617_v10, %s1203_s14 }
 0x2d8   : > { %642 = vrot.lane.b32.xlu1 %v638_v11, %s1203_s14  ;;  %s749_s14 = sshll.u32 %s1419_s12, 4  ;;  %s750_s14 = int_to_ptr.vmem [resolvable:$true] %s749_s14 }
 0x322   : > { %v621_v12 = vpop.permute.xlu2 %620 }
 0x323   : > { %v626_v13 = vsel %vm573_vm2, %v621_v12, 0.0 }
 0x324   : > { %627 = vadd.xlane.f32.xlu1 %v626_v13 }
 0x33d   : > { %705 = vrot.lane.b32.xlu1 %v547_v16, %s1204_s30 }
 0x342   : > { %v623_v17 = vpop.permute.xlu1 %622 }
 0x343   : > { %v629_v18 = vsel %vm573_vm2, %v623_v17, 0.0 }
 0x344   : > { %630 = vadd.xlane.f32.xlu2 %v629_v18 }
 0x34a   : > { %v643_v20 = vpop.permute.xlu1 %642 }
 0x34b   : > { %v649_v21 = vsel %vm648_vm11, %v643_v20, 0.0 }
 0x34c   : > { %650 = vadd.xlane.f32.xlu0 %v649_v21  ;;  %653 = vadd.xlane.f32.xlu2 %v652_v19 }
 0x360   : > { %707 = vrot.lane.b32.xlu0 %v550_v23, %s1204_s30 }
 0x364   : > { %716 = vrot.lane.b32.xlu2 %v1429_v24, %s1204_s30 }
 0x368   : > { %718 = vrot.lane.b32.xlu0 %v1433_v28, %s1204_s30 }
 0x397   : > { %v628_v25 = vpop.xlane.xlu1 %627 }
 0x3af   : > { %v706_v26 = vpop.permute.xlu1 %705 }
 0x3b0   : > { %712 = vst.msk [vmem:[%s1419_s12] sm:$0xff] %vm711_vm12, %v706_v26 }
 0x3b7   : > { %v631_v27 = vpop.xlane.xlu2 %630 }
 0x3bf   : > { %v654_v30 = vpop.xlane.xlu2 %653  ;;  %v651_v31 = vpop.xlane.xlu0 %650 }
 0x3c0   : > { %v656_v32 = vadd.f32 %v654_v30, %v631_v27  ;;  %v655_v33 = vadd.f32 %v651_v31, %v628_v25 }
 0x3c2   : > { %v662_v34 = vadd.f32 %v977_v29, %v656_v32  ;;  %v661_v35 = vadd.f32 %v977_v29, %v655_v33 }
 0x3c4   : > { %v876_v36 = vmul.f32 -1.442695, %v662_v34  ;;  %v875_v24 = vmul.f32 -1.442695, %v661_v35 }
 0x3c6   : > { %994 = vpow2.f32 %v876_v36 }
 0x3c7   : > { %996 = vpow2.f32 %v875_v24  ;;  %v717_v28 = vpop.permute.xlu2 %716 }
 0x3c8   : > { %723 = vst.msk [vmem:[%s1419_s12] sm:$0xff] %vm722_vm13, %v717_v28 }
 0x3cc   : > { %v995_v37 = vpop.eup %994 }
 0x3cd   : > { %v997_v38 = vpop.eup %996  ;;  %v670_v39 = vadd.f32 1.0, %v995_v37 }
 0x3ce   : > { %v669_v40 = vadd.f32 1.0, %v997_v38 }
 0x3cf   : > { %998 = vrcp.f32 %v670_v39  ;;  %v697_v47 = vand.u32 2147483648, %v670_v39  ;;  %v695_v51 = vand.u32 2147483647, %v670_v39  ;;  %vm691_vm0 = vweird.f32 %v670_v39 }
 0x3d0   : > { %1000 = vrcp.f32 %v669_v40  ;;  %v682_v52 = vand.u32 2147483648, %v669_v40  ;;  %v680_v54 = vand.u32 2147483647, %v669_v40  ;;  %vm676_vm2 = vweird.f32 %v669_v40 }
 0x3d1   : > { %v698_v56 = vor.u32 1.1754944e-38, %v697_v47  ;;  %vm696_vm3 = vcmp.eq.f32.partialorder %v695_v51, 8.507059e+37 }
 0x3d2   : > { %v708_v41 = vpop.permute.xlu0 %707  ;;  %v683_v59 = vor.u32 1.1754944e-38, %v682_v52  ;;  %vm681_vm5 = vcmp.eq.f32.partialorder %v680_v54, 8.507059e+37 }
 0x3d3   : > { %713 = vst.msk [vmem:[%s1419_s12 + $0x8] sm:$0xff] %vm711_vm12, %v708_v41 }
 0x3d5   : > { %v999_v42 = vpop.eup %998 }
 0x3d6   : > { %v1001_v43 = vpop.eup %1000  ;;  %v687_v44 = vmul.f32 %v999_v42, %v670_v39  ;;  %vm692_vm14 = vweird.f32 %v999_v42 }
 0x3d7   : > { %v672_v45 = vmul.f32 %v1001_v43, %v669_v40  ;;  %vm677_vm15 = vweird.f32 %v1001_v43  ;;  %vm693_vm1 = vmor %vm691_vm0, %vm692_vm14 }
 0x3d8   : > { %v688_v46 = vsub.f32 1.0, %v687_v44  ;;  %vm678_vm4 = vmor %vm676_vm2, %vm677_vm15 }
 0x3d9   : > { %v673_v48 = vsub.f32 1.0, %v672_v45 }
 0x3da   : > { %v719_v49 = vpop.permute.xlu0 %718  ;;  %v689_v50 = vmul.f32 %v999_v42, %v688_v46 }
 0x3db   : > { %724 = vst.msk [vmem:[%s1419_s12 + $0x8] sm:$0xff] %vm722_vm13, %v719_v49  ;;  %v674_v53 = vmul.f32 %v1001_v43, %v673_v48 }
 0x3dc   : > { %v690_v55 = vadd.f32 %v999_v42, %v689_v50 }
 0x3dd   : > { %v675_v57 = vadd.f32 %v1001_v43, %v674_v53 }
 0x3de   : > { %v694_v58 = vsel %vm693_vm1, %v999_v42, %v690_v55 }
 0x3df   : > { %v699_v60 = vsel %vm696_vm3, %v698_v56, %v694_v58  ;;  %v679_v61 = vsel %vm678_vm4, %v1001_v43, %v675_v57 }
 0x3e0   : > { %729 = vrot.lane.b32.xlu2 %v699_v60, %s1205_s28  ;;  %v684_v62 = vsel %vm681_vm5, %v683_v59, %v679_v61 }
 0x3e1   : > { %727 = vrot.lane.b32.xlu1 %v684_v62, %s1205_s28 }
 0x43a   : > { %v730_v63 = vpop.permute.xlu2 %729 }
 0x43b   : > { %735 = vst.msk [vmem:[%s1419_s12 + $0x8] sm:$0xff] %vm733_vm6, %v730_v63 }
 0x453   : > { %v728_v0 = vpop.permute.xlu1 %727 }
 0x454   : > { %734 = vst.msk [vmem:[%s1419_s12] sm:$0xff] %vm733_vm6, %v728_v0 }
 0x455   : > { %1149 = shalt.err (!%p1146_p10)
}
 0x456   : > { %s1206_s1 = smov 128   ;;  %s1207_s12 = smov 8  }
 0x457   : > { %902 = dma.vmem_to_hbm [thread:$0]  (%p1357_p3), %s750_s14, 256, %s752_s23, %s737_s24, %s1206_s1, %s1206_s1, %s1207_s12  }
 0x458 PF: > { %s766_s20 = sand.u32 1, %s1184_s15   ;;  %p1541_p12 = scmp.ge.s32.totalorder %s1196_s18, 2 }
 0x459   : > { %s767_s25 = scalar_lea.sflag [#allocation5], %s766_s20 }
 0x45a   : > { %p919_p13 = pnand %p1541_p12, %p1301_p6 }
 0x45c   : > { %p920_p0 = pneg %p919_p13 }
 0x45e   : > { %1179 = dma.done.wait (%p920_p0), %s767_s25, 256  }
 0x45f   : > { %1181 = vsyncadd (%p920_p0), %s767_s25, 4294967040  ;;  %p27_p5 = scmp.ge.s32.totalorder %s1339_s29, 4   ;;  %s1542_s15 = smov %s1188_s16 }
 0x460   : > { %s1543_s16 = smov %s1192_s17  ;;  %s1544_s17 = smov %s1353_s22 }
 0x461   : > { %s1545_s18 = smov %s1339_s29  ;;  %29 = sbr.rel (!%p27_p5) target bundleno = 11 (0xb), region = 117 }
 0x466   :  { %773 = vsyncpa [#allocation4], 1 }
 0x467   :  { %775 = vsyncpa [#allocation4 + $0x1], 1 }
 0x468   :  { %776 = vsyncpa [#allocation7], 1 }
 0x469   :  { %777 = vsyncpa [#allocation10], 1 }
 0x46a   :  { %778 = vsyncpa [#allocation5], 1 }
 0x46b   :  { %780 = vsyncpa [#allocation5 + $0x1], 1 }

</bundles_post_ra>
